<compile_context>
chip_gen: v7x
topology: tpu7x:2x2x1
jax: 0.10.0
libtpu: 0.0.40
codegen_flags: <defaults>
</compile_context>

<pallas_src>
import jax
import jax.numpy as jnp
from jax.experimental import pallas as pl
from jax.experimental.pallas import tpu as pltpu

N = 5            # system size
NA = 2 * N       # augmented width [X_full | A]


def invert_kernel(x_ref, a_ref, o_ref):
    # x_ref: (7,) f32 in SMEM
    # a_ref: (5,10) f32 in VMEM  -- zeros in lanes 0..4, A in lanes 5..9
    # o_ref: (1,1) f32 in SMEM
    f32 = jnp.float32
    row = jax.lax.broadcasted_iota(jnp.int32, (N, NA), 0)
    col = jax.lax.broadcasted_iota(jnp.int32, (N, NA), 1)

    # ---- build X_full directly in registers (left half of aug) ----
    # shuffled_X[i] = X[6 - i]; diagonal (j,j) gets shuffled_X[j] = X[6-j],
    # (0,4) <- shuffled_X[5] = X[1], (4,0) <- shuffled_X[6] = X[0].
    # NOTE: all 7 scatter coordinates are distinct, so masked-add == COO add.
    diag_vals = ((col == 0).astype(f32) * x_ref[6]
                 + (col == 1).astype(f32) * x_ref[5]
                 + (col == 2).astype(f32) * x_ref[4]
                 + (col == 3).astype(f32) * x_ref[3]
                 + (col == 4).astype(f32) * x_ref[2])
    left = jnp.where(row == col, diag_vals + 1.0, 0.0)        # + eye(5)
    left = (left
            + ((row == 0) & (col == 4)).astype(f32) * x_ref[1]
            + ((row == 4) & (col == 0)).astype(f32) * x_ref[0])

    # Augmented system [X_full | A]  (A already sits in lanes 5..9 of a_ref).
    aug = left + a_ref[...]

    # ---- unrolled Gauss-Jordan elimination on the augmented buffer ----
    # TODO(synk): torch.linalg.solve uses partially-pivoted LU; pivoting is
    # omitted here (X_full = I + small perturbation is safely nonsingular).
    row1 = jax.lax.broadcasted_iota(jnp.int32, (N, 1), 0)
    for k in range(N):
        p = aug[k:k + 1, k:k + 1]                      # (1,1) pivot
        inv = pl.reciprocal(p, approx=True)            # EUP vrcp
        inv = inv * (2.0 - p * inv)                    # one NR step -> ~f32 acc
        pivot_row = aug[k:k + 1, :] * inv              # (1, 10)
        factor = aug[:, k:k + 1]                       # (5, 1)
        aug = jnp.where(row1 == k, pivot_row, aug - factor * pivot_row)

    # ---- epilogue: sum((B - I)^2), B = right half of aug, masked in place ----
    eye_shift = (col == row + N).astype(f32)           # 1 at (i, i+5)
    diff = jnp.where(col >= N, aug - eye_shift, 0.0)
    o_ref[0, 0] = jnp.sum(diff * diff)


def invert_forward(X, A):
    """JAX/Pallas equivalent of Invert.forward.

    X: (7,) parameter vector, A: (5,5) input. Returns scalar float32.
    """
    X = X.astype(jnp.float32)
    A = A.astype(jnp.float32)
    # Layout plumbing only: place A in lanes 5..9 of a (5,10) slab so the
    # kernel never has to lane-concatenate.
    A_aug = jnp.pad(A, ((0, 0), (N, 0)))

    out = pl.pallas_call(
        invert_kernel,
        out_shape=jax.ShapeDtypeStruct((1, 1), jnp.float32),
        in_specs=[
            pl.BlockSpec(memory_space=pltpu.MemorySpace.SMEM),   # 7 parameters
            pl.BlockSpec(memory_space=pltpu.MemorySpace.VMEM),   # augmented A
        ],
        out_specs=pl.BlockSpec(memory_space=pltpu.MemorySpace.SMEM),
        cost_estimate=pl.CostEstimate(
            flops=600, transcendentals=5,
            bytes_accessed=4 * (7 + N * NA + 1)),
    )(X, A_aug)
    return out[0, 0]


if __name__ == "__main__":
    key = jax.random.PRNGKey(0)
    kx, ka = jax.random.split(key)

    # Deterministic parameter (7 values, as implied by the sparse indices) and input.
    # |X| ~ 0.1 keeps X_full = I + small perturbation well away from singular
    # (the kernel uses unpivoted elimination).
    X = 0.1 * jax.random.normal(kx, (7,), dtype=jnp.float32)
    A = jax.random.normal(ka, (N, N), dtype=jnp.float32)

    result = invert_forward(X, A)
    result = jax.block_until_ready(result)

    # Pure-JAX reference check of the same math (pivoted LU solve).
    shuffled_X = X[::-1]
    rows = jnp.array([0, 1, 2, 3, 4, 0, 4])
    cols = jnp.array([0, 1, 2, 3, 4, 4, 0])
    X_full = jnp.zeros((N, N), jnp.float32).at[rows, cols].add(shuffled_X) + jnp.eye(N)
    ref = jnp.sum((jnp.linalg.solve(X_full, A) - jnp.eye(N)) ** 2)

    assert jnp.allclose(result, ref, rtol=1e-4, atol=1e-4), (result, ref)
    print("KERNEL_OK")
</pallas_src>

<mosaic_0001>
module attributes {stable_mosaic.version = 11 : i64} {
  func.func @invert_kernel(%arg0: memref<7xf32, #tpu.memory_space<smem>>, %arg1: memref<5x10xf32, #tpu.memory_space<vmem>>, %arg2: memref<1x1xf32, #tpu.memory_space<smem>>) attributes {dimension_semantics = [], scalar_prefetch = 0 : i64, scratch_operands = 0 : i64, tpu.core_type = #tpu.core_type<tc>} {
    %0 = tpu.iota {dimensions = array<i32: 0>} : vector<5x10xi32>
    %1 = tpu.iota {dimensions = array<i32: 1>} : vector<5x10xi32>
    %c0_i32 = arith.constant 0 : i32
    %2 = vector.broadcast %c0_i32 : i32 to vector<5x10xi32>
    %3 = arith.cmpi eq, %1, %2 : vector<5x10xi32>
    %4 = arith.extui %3 : vector<5x10xi1> to vector<5x10xi32>
    %5 = arith.sitofp %4 : vector<5x10xi32> to vector<5x10xf32>
    %c6 = arith.constant 6 : index
    %6 = memref.load %arg0[%c6] : memref<7xf32, #tpu.memory_space<smem>>
    %7 = vector.broadcast %6 : f32 to vector<5x10xf32>
    %8 = arith.mulf %5, %7 : vector<5x10xf32>
    %c1_i32 = arith.constant 1 : i32
    %9 = vector.broadcast %c1_i32 : i32 to vector<5x10xi32>
    %10 = arith.cmpi eq, %1, %9 : vector<5x10xi32>
    %11 = arith.extui %10 : vector<5x10xi1> to vector<5x10xi32>
    %12 = arith.sitofp %11 : vector<5x10xi32> to vector<5x10xf32>
    %c5 = arith.constant 5 : index
    %13 = memref.load %arg0[%c5] : memref<7xf32, #tpu.memory_space<smem>>
    %14 = vector.broadcast %13 : f32 to vector<5x10xf32>
    %15 = arith.mulf %12, %14 : vector<5x10xf32>
    %16 = arith.addf %8, %15 : vector<5x10xf32>
    %c2_i32 = arith.constant 2 : i32
    %17 = vector.broadcast %c2_i32 : i32 to vector<5x10xi32>
    %18 = arith.cmpi eq, %1, %17 : vector<5x10xi32>
    %19 = arith.extui %18 : vector<5x10xi1> to vector<5x10xi32>
    %20 = arith.sitofp %19 : vector<5x10xi32> to vector<5x10xf32>
    %c4 = arith.constant 4 : index
    %21 = memref.load %arg0[%c4] : memref<7xf32, #tpu.memory_space<smem>>
    %22 = vector.broadcast %21 : f32 to vector<5x10xf32>
    %23 = arith.mulf %20, %22 : vector<5x10xf32>
    %24 = arith.addf %16, %23 : vector<5x10xf32>
    %c3_i32 = arith.constant 3 : i32
    %25 = vector.broadcast %c3_i32 : i32 to vector<5x10xi32>
    %26 = arith.cmpi eq, %1, %25 : vector<5x10xi32>
    %27 = arith.extui %26 : vector<5x10xi1> to vector<5x10xi32>
    %28 = arith.sitofp %27 : vector<5x10xi32> to vector<5x10xf32>
    %c3 = arith.constant 3 : index
    %29 = memref.load %arg0[%c3] : memref<7xf32, #tpu.memory_space<smem>>
    %30 = vector.broadcast %29 : f32 to vector<5x10xf32>
    %31 = arith.mulf %28, %30 : vector<5x10xf32>
    %32 = arith.addf %24, %31 : vector<5x10xf32>
    %c4_i32 = arith.constant 4 : i32
    %33 = vector.broadcast %c4_i32 : i32 to vector<5x10xi32>
    %34 = arith.cmpi eq, %1, %33 : vector<5x10xi32>
    %35 = arith.extui %34 : vector<5x10xi1> to vector<5x10xi32>
    %36 = arith.sitofp %35 : vector<5x10xi32> to vector<5x10xf32>
    %c2 = arith.constant 2 : index
    %37 = memref.load %arg0[%c2] : memref<7xf32, #tpu.memory_space<smem>>
    %38 = vector.broadcast %37 : f32 to vector<5x10xf32>
    %39 = arith.mulf %36, %38 : vector<5x10xf32>
    %40 = arith.addf %32, %39 : vector<5x10xf32>
    %41 = arith.cmpi eq, %0, %1 : vector<5x10xi32>
    %cst = arith.constant 1.000000e+00 : f32
    %42 = vector.broadcast %cst : f32 to vector<5x10xf32>
    %43 = arith.addf %40, %42 : vector<5x10xf32>
    %cst_0 = arith.constant 0.000000e+00 : f32
    %44 = vector.broadcast %cst_0 : f32 to vector<5x10xf32>
    %45 = arith.select %41, %43, %44 : vector<5x10xi1>, vector<5x10xf32>
    %c0_i32_1 = arith.constant 0 : i32
    %46 = vector.broadcast %c0_i32_1 : i32 to vector<5x10xi32>
    %47 = arith.cmpi eq, %0, %46 : vector<5x10xi32>
    %c4_i32_2 = arith.constant 4 : i32
    %48 = vector.broadcast %c4_i32_2 : i32 to vector<5x10xi32>
    %49 = arith.cmpi eq, %1, %48 : vector<5x10xi32>
    %50 = arith.andi %47, %49 : vector<5x10xi1>
    %51 = arith.extui %50 : vector<5x10xi1> to vector<5x10xi32>
    %52 = arith.sitofp %51 : vector<5x10xi32> to vector<5x10xf32>
    %c1 = arith.constant 1 : index
    %53 = memref.load %arg0[%c1] : memref<7xf32, #tpu.memory_space<smem>>
    %54 = vector.broadcast %53 : f32 to vector<5x10xf32>
    %55 = arith.mulf %52, %54 : vector<5x10xf32>
    %56 = arith.addf %45, %55 : vector<5x10xf32>
    %c4_i32_3 = arith.constant 4 : i32
    %57 = vector.broadcast %c4_i32_3 : i32 to vector<5x10xi32>
    %58 = arith.cmpi eq, %0, %57 : vector<5x10xi32>
    %c0_i32_4 = arith.constant 0 : i32
    %59 = vector.broadcast %c0_i32_4 : i32 to vector<5x10xi32>
    %60 = arith.cmpi eq, %1, %59 : vector<5x10xi32>
    %61 = arith.andi %58, %60 : vector<5x10xi1>
    %62 = arith.extui %61 : vector<5x10xi1> to vector<5x10xi32>
    %63 = arith.sitofp %62 : vector<5x10xi32> to vector<5x10xf32>
    %c0 = arith.constant 0 : index
    %64 = memref.load %arg0[%c0] : memref<7xf32, #tpu.memory_space<smem>>
    %65 = vector.broadcast %64 : f32 to vector<5x10xf32>
    %66 = arith.mulf %63, %65 : vector<5x10xf32>
    %67 = arith.addf %56, %66 : vector<5x10xf32>
    %c0_5 = arith.constant 0 : index
    %c0_6 = arith.constant 0 : index
    %68 = vector.load %arg1[%c0_5, %c0_6] : memref<5x10xf32, #tpu.memory_space<vmem>>, vector<5x10xf32>
    %69 = arith.addf %67, %68 : vector<5x10xf32>
    %70 = tpu.iota {dimensions = array<i32: 0>} : vector<5x1xi32>
    %71 = vector.extract_strided_slice %69 {offsets = [0, 0], sizes = [1, 1], strides = [1, 1]} : vector<5x10xf32> to vector<1x1xf32>
    %72 = tpu.reciprocal %71 {approx = true} : vector<1x1xf32> -> vector<1x1xf32>
    %73 = arith.mulf %71, %72 : vector<1x1xf32>
    %cst_7 = arith.constant 2.000000e+00 : f32
    %74 = vector.broadcast %cst_7 : f32 to vector<1x1xf32>
    %75 = arith.subf %74, %73 : vector<1x1xf32>
    %76 = arith.mulf %72, %75 : vector<1x1xf32>
    %77 = vector.extract_strided_slice %69 {offsets = [0, 0], sizes = [1, 10], strides = [1, 1]} : vector<5x10xf32> to vector<1x10xf32>
    %78 = vector.broadcast %76 : vector<1x1xf32> to vector<1x10xf32>
    %79 = arith.mulf %77, %78 : vector<1x10xf32>
    %80 = vector.extract_strided_slice %69 {offsets = [0, 0], sizes = [5, 1], strides = [1, 1]} : vector<5x10xf32> to vector<5x1xf32>
    %c0_i32_8 = arith.constant 0 : i32
    %81 = vector.broadcast %c0_i32_8 : i32 to vector<5x1xi32>
    %82 = arith.cmpi eq, %70, %81 : vector<5x1xi32>
    %83 = vector.broadcast %80 : vector<5x1xf32> to vector<5x10xf32>
    %84 = vector.broadcast %79 : vector<1x10xf32> to vector<5x10xf32>
    %85 = arith.mulf %83, %84 : vector<5x10xf32>
    %86 = arith.subf %69, %85 : vector<5x10xf32>
    %87 = vector.shape_cast %82 : vector<5x1xi1> to vector<5x1xi1>
    %88 = vector.broadcast %87 : vector<5x1xi1> to vector<5x10xi1>
    %89 = vector.shape_cast %79 : vector<1x10xf32> to vector<1x10xf32>
    %90 = vector.broadcast %89 : vector<1x10xf32> to vector<5x10xf32>
    %91 = arith.select %88, %90, %86 : vector<5x10xi1>, vector<5x10xf32>
    %92 = vector.extract_strided_slice %91 {offsets = [1, 1], sizes = [1, 1], strides = [1, 1]} : vector<5x10xf32> to vector<1x1xf32>
    %93 = tpu.reciprocal %92 {approx = true} : vector<1x1xf32> -> vector<1x1xf32>
    %94 = arith.mulf %92, %93 : vector<1x1xf32>
    %cst_9 = arith.constant 2.000000e+00 : f32
    %95 = vector.broadcast %cst_9 : f32 to vector<1x1xf32>
    %96 = arith.subf %95, %94 : vector<1x1xf32>
    %97 = arith.mulf %93, %96 : vector<1x1xf32>
    %98 = vector.extract_strided_slice %91 {offsets = [1, 0], sizes = [1, 10], strides = [1, 1]} : vector<5x10xf32> to vector<1x10xf32>
    %99 = vector.broadcast %97 : vector<1x1xf32> to vector<1x10xf32>
    %100 = arith.mulf %98, %99 : vector<1x10xf32>
    %101 = vector.extract_strided_slice %91 {offsets = [0, 1], sizes = [5, 1], strides = [1, 1]} : vector<5x10xf32> to vector<5x1xf32>
    %c1_i32_10 = arith.constant 1 : i32
    %102 = vector.broadcast %c1_i32_10 : i32 to vector<5x1xi32>
    %103 = arith.cmpi eq, %70, %102 : vector<5x1xi32>
    %104 = vector.broadcast %101 : vector<5x1xf32> to vector<5x10xf32>
    %105 = vector.broadcast %100 : vector<1x10xf32> to vector<5x10xf32>
    %106 = arith.mulf %104, %105 : vector<5x10xf32>
    %107 = arith.subf %91, %106 : vector<5x10xf32>
    %108 = vector.shape_cast %103 : vector<5x1xi1> to vector<5x1xi1>
    %109 = vector.broadcast %108 : vector<5x1xi1> to vector<5x10xi1>
    %110 = vector.shape_cast %100 : vector<1x10xf32> to vector<1x10xf32>
    %111 = vector.broadcast %110 : vector<1x10xf32> to vector<5x10xf32>
    %112 = arith.select %109, %111, %107 : vector<5x10xi1>, vector<5x10xf32>
    %113 = vector.extract_strided_slice %112 {offsets = [2, 2], sizes = [1, 1], strides = [1, 1]} : vector<5x10xf32> to vector<1x1xf32>
    %114 = tpu.reciprocal %113 {approx = true} : vector<1x1xf32> -> vector<1x1xf32>
    %115 = arith.mulf %113, %114 : vector<1x1xf32>
    %cst_11 = arith.constant 2.000000e+00 : f32
    %116 = vector.broadcast %cst_11 : f32 to vector<1x1xf32>
    %117 = arith.subf %116, %115 : vector<1x1xf32>
    %118 = arith.mulf %114, %117 : vector<1x1xf32>
    %119 = vector.extract_strided_slice %112 {offsets = [2, 0], sizes = [1, 10], strides = [1, 1]} : vector<5x10xf32> to vector<1x10xf32>
    %120 = vector.broadcast %118 : vector<1x1xf32> to vector<1x10xf32>
    %121 = arith.mulf %119, %120 : vector<1x10xf32>
    %122 = vector.extract_strided_slice %112 {offsets = [0, 2], sizes = [5, 1], strides = [1, 1]} : vector<5x10xf32> to vector<5x1xf32>
    %c2_i32_12 = arith.constant 2 : i32
    %123 = vector.broadcast %c2_i32_12 : i32 to vector<5x1xi32>
    %124 = arith.cmpi eq, %70, %123 : vector<5x1xi32>
    %125 = vector.broadcast %122 : vector<5x1xf32> to vector<5x10xf32>
    %126 = vector.broadcast %121 : vector<1x10xf32> to vector<5x10xf32>
    %127 = arith.mulf %125, %126 : vector<5x10xf32>
    %128 = arith.subf %112, %127 : vector<5x10xf32>
    %129 = vector.shape_cast %124 : vector<5x1xi1> to vector<5x1xi1>
    %130 = vector.broadcast %129 : vector<5x1xi1> to vector<5x10xi1>
    %131 = vector.shape_cast %121 : vector<1x10xf32> to vector<1x10xf32>
    %132 = vector.broadcast %131 : vector<1x10xf32> to vector<5x10xf32>
    %133 = arith.select %130, %132, %128 : vector<5x10xi1>, vector<5x10xf32>
    %134 = vector.extract_strided_slice %133 {offsets = [3, 3], sizes = [1, 1], strides = [1, 1]} : vector<5x10xf32> to vector<1x1xf32>
    %135 = tpu.reciprocal %134 {approx = true} : vector<1x1xf32> -> vector<1x1xf32>
    %136 = arith.mulf %134, %135 : vector<1x1xf32>
    %cst_13 = arith.constant 2.000000e+00 : f32
    %137 = vector.broadcast %cst_13 : f32 to vector<1x1xf32>
    %138 = arith.subf %137, %136 : vector<1x1xf32>
    %139 = arith.mulf %135, %138 : vector<1x1xf32>
    %140 = vector.extract_strided_slice %133 {offsets = [3, 0], sizes = [1, 10], strides = [1, 1]} : vector<5x10xf32> to vector<1x10xf32>
    %141 = vector.broadcast %139 : vector<1x1xf32> to vector<1x10xf32>
    %142 = arith.mulf %140, %141 : vector<1x10xf32>
    %143 = vector.extract_strided_slice %133 {offsets = [0, 3], sizes = [5, 1], strides = [1, 1]} : vector<5x10xf32> to vector<5x1xf32>
    %c3_i32_14 = arith.constant 3 : i32
    %144 = vector.broadcast %c3_i32_14 : i32 to vector<5x1xi32>
    %145 = arith.cmpi eq, %70, %144 : vector<5x1xi32>
    %146 = vector.broadcast %143 : vector<5x1xf32> to vector<5x10xf32>
    %147 = vector.broadcast %142 : vector<1x10xf32> to vector<5x10xf32>
    %148 = arith.mulf %146, %147 : vector<5x10xf32>
    %149 = arith.subf %133, %148 : vector<5x10xf32>
    %150 = vector.shape_cast %145 : vector<5x1xi1> to vector<5x1xi1>
    %151 = vector.broadcast %150 : vector<5x1xi1> to vector<5x10xi1>
    %152 = vector.shape_cast %142 : vector<1x10xf32> to vector<1x10xf32>
    %153 = vector.broadcast %152 : vector<1x10xf32> to vector<5x10xf32>
    %154 = arith.select %151, %153, %149 : vector<5x10xi1>, vector<5x10xf32>
    %155 = vector.extract_strided_slice %154 {offsets = [4, 4], sizes = [1, 1], strides = [1, 1]} : vector<5x10xf32> to vector<1x1xf32>
    %156 = tpu.reciprocal %155 {approx = true} : vector<1x1xf32> -> vector<1x1xf32>
    %157 = arith.mulf %155, %156 : vector<1x1xf32>
    %cst_15 = arith.constant 2.000000e+00 : f32
    %158 = vector.broadcast %cst_15 : f32 to vector<1x1xf32>
    %159 = arith.subf %158, %157 : vector<1x1xf32>
    %160 = arith.mulf %156, %159 : vector<1x1xf32>
    %161 = vector.extract_strided_slice %154 {offsets = [4, 0], sizes = [1, 10], strides = [1, 1]} : vector<5x10xf32> to vector<1x10xf32>
    %162 = vector.broadcast %160 : vector<1x1xf32> to vector<1x10xf32>
    %163 = arith.mulf %161, %162 : vector<1x10xf32>
    %164 = vector.extract_strided_slice %154 {offsets = [0, 4], sizes = [5, 1], strides = [1, 1]} : vector<5x10xf32> to vector<5x1xf32>
    %c4_i32_16 = arith.constant 4 : i32
    %165 = vector.broadcast %c4_i32_16 : i32 to vector<5x1xi32>
    %166 = arith.cmpi eq, %70, %165 : vector<5x1xi32>
    %167 = vector.broadcast %164 : vector<5x1xf32> to vector<5x10xf32>
    %168 = vector.broadcast %163 : vector<1x10xf32> to vector<5x10xf32>
    %169 = arith.mulf %167, %168 : vector<5x10xf32>
    %170 = arith.subf %154, %169 : vector<5x10xf32>
    %171 = vector.shape_cast %166 : vector<5x1xi1> to vector<5x1xi1>
    %172 = vector.broadcast %171 : vector<5x1xi1> to vector<5x10xi1>
    %173 = vector.shape_cast %163 : vector<1x10xf32> to vector<1x10xf32>
    %174 = vector.broadcast %173 : vector<1x10xf32> to vector<5x10xf32>
    %175 = arith.select %172, %174, %170 : vector<5x10xi1>, vector<5x10xf32>
    %c5_i32 = arith.constant 5 : i32
    %176 = vector.broadcast %c5_i32 : i32 to vector<5x10xi32>
    %177 = arith.addi %0, %176 : vector<5x10xi32>
    %178 = arith.cmpi eq, %1, %177 : vector<5x10xi32>
    %179 = arith.extui %178 : vector<5x10xi1> to vector<5x10xi32>
    %180 = arith.sitofp %179 : vector<5x10xi32> to vector<5x10xf32>
    %c5_i32_17 = arith.constant 5 : i32
    %181 = vector.broadcast %c5_i32_17 : i32 to vector<5x10xi32>
    %182 = arith.cmpi sge, %1, %181 : vector<5x10xi32>
    %183 = arith.subf %175, %180 : vector<5x10xf32>
    %cst_18 = arith.constant 0.000000e+00 : f32
    %184 = vector.broadcast %cst_18 : f32 to vector<5x10xf32>
    %185 = arith.select %182, %183, %184 : vector<5x10xi1>, vector<5x10xf32>
    %186 = arith.mulf %185, %185 : vector<5x10xf32>
    %187 = vector.shape_cast %186 : vector<5x10xf32> to vector<1x5x10xf32>
    %cst_19 = arith.constant dense<0.000000e+00> : vector<1xf32>
    %188 = vector.multi_reduction <add>, %187, %cst_19 [1, 2] : vector<1x5x10xf32> to vector<1xf32>
    %189 = vector.shape_cast %188 : vector<1xf32> to vector<1x1x1xf32>
    %190 = vector.extract %189[0, 0, 0] : f32 from vector<1x1x1xf32>
    %c0_20 = arith.constant 0 : index
    %c0_21 = arith.constant 0 : index
    %191 = memref.load %arg2[%c0_20, %c0_21] : memref<1x1xf32, #tpu.memory_space<smem>>
    memref.store %190, %arg2[%c0_20, %c0_21] : memref<1x1xf32, #tpu.memory_space<smem>>
    return
  }
}

</mosaic_0001>

<bundles_post_ra>
// kernel: tpu_custom_call.1
= control target key start
LH: loop header
LB: loop body
LE: loop exit
PB: predicated region body
PF: predicated region fallthrough
CT: control target
= control target key end

     0   :  { %7 = vsyncpa [#allocation4], 0  ;;  %s448_s0 = inlined_call_operand.hbm [shape: f32[7], index: 0, kind: input, shape index: {}]   ;;  %s449_s1 = inlined_call_operand.hbm [shape: f32[5,10], index: 1, kind: input, shape index: {}]   ;;  %s450_s2 = inlined_call_operand.hbm [shape: f32[1,1], index: 2, kind: output, shape index: {}]  }
   0x1   :  { %8 = vsyncpa [#allocation3], 0 }
   0x2   :  { %9 = vsyncpa [#allocation5], 0  ;;  %s296_s11 = scalar_lea.hbm %s448_s0, 16 }
   0x3   :  { %p297_p0 = scmp.ne.s32.totalorder %s448_s0, %s296_s11  ;;  %p300_p1 = scmp.lt.u32.totalorder %s296_s11, %s448_s0 }
   0x5   :  { %p302_p2 = pnand %p300_p1, %p297_p0 }
   0x7   :  { %305 = shalt.err (!%p302_p2)
}
   0x8   :  { %s344_s16 = smov [#allocation2]   ;;  %s345_s19 = smov [#allocation6]  }
   0x9   :  { %17 = dma.hbm_to_smem %s448_s0, 16, %s344_s16, [#allocation4]  }
   0xa   :  { %s24_s20 = sshll.u32 %s345_s19, 4  ;;  %s306_s23 = scalar_lea.hbm %s449_s1, 128  ;;  %s25_s20 = int_to_ptr.vmem [resolvable:$true] %s24_s20 }
   0xb   :  { %p307_p3 = scmp.ne.s32.totalorder %s449_s1, %s306_s23  ;;  %p310_p4 = scmp.lt.u32.totalorder %s306_s23, %s449_s1 }
   0xd   :  { %p312_p5 = pnand %p310_p4, %p307_p3 }
   0xf   :  { %315 = shalt.err (!%p312_p5)
}
  0x10   :  { %s316_s28 = scalar_lea.vmem %s25_s20, 128  ;;  %p321_p7 = scmp.lt.s32.totalorder %s25_s20, %s25_s20 }
  0x11   :  { %p317_p6 = scmp.ne.s32.totalorder %s25_s20, %s316_s28  ;;  %p322_p8 = scmp.lt.s32.totalorder %s316_s28, %s316_s28 }
  0x13   :  { %p323_p9 = por %p322_p8, %p321_p7 }
  0x15   :  { %p324_p10 = pnand %p323_p9, %p317_p6 }
  0x17   :  { %327 = shalt.err (!%p324_p10)
}
  0x18   :  { %27 = dma.hbm_to_vmem [thread:$0]  %s449_s1, 128, %s25_s20, [#allocation3]  }
  0x19   :  { %338 = dma.done.wait [#allocation4], 16  }
  0x1a   :  { %339 = vsyncadd [#allocation4], 4294967280 }
  0x1b   :  { %340 = dma.done.wait [#allocation3], 128  }
  0x1c   :  { %341 = vsyncadd [#allocation3], 4294967168 }
  0x1d   :  { %34 = sfence }
  0x1e   :  { %v35_v0 = vlaneseq  ;;  %s254_s30 = sld [smem:[#allocation2 + $0x6]]  ;;  %s256_s3 = sld [smem:[#allocation2 + $0x5]]  ;;  %v346_v1 = vmov 0   ;;  %v347_v4 = vmov 0.0   ;;  %v92_v33 = vld [vmem:[#allocation6] sm:$0x1f] }
  0x1f   :  { %278 = vset.pattern.permute.xlu0 %v346_v1  ;;  %s258_s4 = sld [smem:[#allocation2 + $0x4]]  ;;  %s260_s5 = sld [smem:[#allocation2 + $0x3]]  ;;  %v348_v40 = vmov 1   ;;  %v349_v53 = vmov 2   ;;  %vm225_vm15 = vcmask 77824  }
  0x20   :  { %v392_v2 = vand.u32 127, %v35_v0  ;;  %s262_s6 = sld [smem:[#allocation2 + $0x2]]  ;;  %v398_v3 = vshrl.u32 %v35_v0, 7  ;;  %s264_s1 = sld [smem:[#allocation2 + $0x1]]  ;;  %279 = vset.pattern.permute.xlu1 %v348_v40 }
  0x21   :  { %s88_s7 = sld [smem:[#allocation2]]  ;;  %s328_s11 = scalar_lea.hbm %s450_s2, 16 }
  0x22   :  { %vm39_vm0 = vcmp.eq.s32.totalorder %v392_v2, 0  ;;  %vm45_vm1 = vcmp.eq.s32.totalorder %v392_v2, 1  ;;  %vm52_vm2 = vcmp.eq.s32.totalorder %v392_v2, 2  ;;  %vm59_vm3 = vcmp.eq.s32.totalorder %v392_v2, 3  ;;  %p329_p11 = scmp.ne.s32.totalorder %s450_s2, %s328_s11  ;;  %p332_p12 = scmp.lt.u32.totalorder %s328_s11, %s450_s2 }
  0x23   :  { %v253_v5 = vsel %vm39_vm0, 1.0, %v347_v4  ;;  %v255_v6 = vsel %vm45_vm1, 1.0, %v347_v4  ;;  %v257_v7 = vsel %vm52_vm2, 1.0, %v347_v4  ;;  %v259_v10 = vsel %vm59_vm3, 1.0, %v347_v4 }
  0x24   :  { %v43_v8 = vstv %s254_s30  ;;  %v49_v9 = vstv %s256_s3  ;;  %vm66_vm4 = vcmp.eq.s32.totalorder %v392_v2, 4  ;;  %vm76_vm5 = vcmp.eq.s32.totalorder %v398_v3, 0  ;;  %p334_p13 = pnand %p332_p12, %p329_p11 }
  0x25   :  { %v44_v11 = vmul.f32 %v253_v5, %v43_v8  ;;  %v50_v12 = vmul.f32 %v255_v6, %v49_v9  ;;  %v56_v13 = vstv %s258_s4  ;;  %v63_v14 = vstv %s260_s5  ;;  %vm77_vm6 = vmand %vm76_vm5, %vm66_vm4 }
  0x26   :  { %v57_v15 = vmul.f32 %v257_v7, %v56_v13  ;;  %v261_v16 = vsel %vm66_vm4, 1.0, %v347_v4  ;;  %v70_v17 = vstv %s262_s6  ;;  %v64_v19 = vmul.f32 %v259_v10, %v63_v14 }
  0x27   :  { %v51_v18 = vadd.f32 %v50_v12, %v44_v11  ;;  %vm84_vm7 = vcmp.eq.s32.totalorder %v398_v3, 4  ;;  %v71_v21 = vmul.f32 %v261_v16, %v70_v17  ;;  %v263_v23 = vsel %vm77_vm6, 1.0, %v347_v4 }
  0x28   :  { %vm85_vm8 = vmand %vm84_vm7, %vm39_vm0  ;;  %v81_v24 = vstv %s264_s1  ;;  %v89_v27 = vstv %s88_s7  ;;  %vm73_vm9 = vcmp.eq.s32.totalorder %v398_v3, %v392_v2  ;;  %v111_v41 = vsub.s32 0, %v398_v3 }
  0x29   :  { %v58_v20 = vadd.f32 %v57_v15, %v51_v18  ;;  %v265_v26 = vsel %vm85_vm8, 1.0, %v347_v4  ;;  %v82_v28 = vmul.f32 %v263_v23, %v81_v24  ;;  %v136_v54 = vsub.s32 1, %v398_v3 }
  0x2a   :  { %v90_v30 = vmul.f32 %v265_v26, %v89_v27  ;;  %vm128_vm10 = vcmp.eq.s32.totalorder %v398_v3, 1  ;;  %v350_v5 = vmov 3   ;;  %v161_v6 = vsub.s32 2, %v398_v3 }
  0x2b   :  { %v65_v22 = vadd.f32 %v64_v19, %v58_v20  ;;  %vm153_vm11 = vcmp.eq.s32.totalorder %v398_v3, 2  ;;  %v351_v18 = vmov 4   ;;  %v186_v19 = vsub.s32 3, %v398_v3 }
  0x2c   :  { %vm178_vm12 = vcmp.eq.s32.totalorder %v398_v3, 3  ;;  %vm221_vm14 = vcmp.ge.s32.totalorder %v392_v2, 5 }
  0x2d   :  { %v72_v25 = vadd.f32 %v71_v21, %v65_v22 }
  0x2f   :  { %v74_v29 = vadd.f32 1.0, %v72_v25 }
  0x31   :  { %v75_v31 = vsel %vm73_vm9, %v74_v29, 0.0 }
  0x32   :  { %v83_v32 = vadd.f32 %v82_v28, %v75_v31  ;;  %v210_v31 = vsub.s32 4, %v398_v3 }
  0x34   :  { %v91_v34 = vadd.f32 %v90_v30, %v83_v32 }
  0x36   :  { %v93_v35 = vadd.f32 %v92_v33, %v91_v34  ;;  %v217_v33 = vadd.s32 5, %v398_v3 }
  0x38   :  { %286 = vrcp.f32 %v93_v35  ;;  %vm218_vm13 = vcmp.eq.s32.totalorder %v392_v2, %v217_v33 }
  0x42   :  { %v287_v36 = vpop.eup %286 }
  0x43   :  { %v95_v37 = vmul.f32 %v287_v36, %v93_v35 }
  0x45   :  { %v96_v38 = vsub.f32 2.0, %v95_v37 }
  0x47   :  { %v97_v39 = vmul.f32 %v287_v36, %v96_v38 }
  0x49   :  { %100 = vperm.xlu0 %278, %v97_v39   ;;  %v266_v39 = vsel %vm218_vm13, 1.0, %v347_v4 }
  0x4d   :  { %106 = vperm.xlu0 %278, %v93_v35  }
  0x51   :  { %280 = vset.pattern.permute.xlu0 %v349_v53 }
  0xc8   :  { %v101_v42 = vpop.permute.xlu0 %100 }
  0xc9   :  { %v103_v43 = vmul.f32 %v101_v42, %v93_v35 }
  0xcb   :  { %v112_v44 = vrot.slane %v103_v43, %v111_v41 }
  0xcc   :  { %v107_v45 = vpop.permute.xlu0 %106 }
  0xcd   :  { %v113_v46 = vmul.f32 %v112_v44, %v107_v45 }
  0xcf   :  { %v114_v47 = vsub.f32 %v93_v35, %v113_v46 }
  0xd1   :  { %v117_v48 = vsel %vm76_vm5, %v112_v44, %v114_v47 }
  0xd2   :  { %288 = vrcp.f32 %v117_v48 }
  0xdc   :  { %v289_v49 = vpop.eup %288 }
  0xdd   :  { %v119_v50 = vmul.f32 %v289_v49, %v117_v48 }
  0xdf   :  { %v120_v51 = vsub.f32 2.0, %v119_v50 }
  0xe1   :  { %v121_v52 = vmul.f32 %v289_v49, %v120_v51 }
  0xe3   :  { %124 = vperm.xlu1 %279, %v121_v52  }
  0xe7   :  { %131 = vperm.xlu1 %279, %v117_v48  }
  0xeb   :  { %281 = vset.pattern.permute.xlu1 %v349_v53 }
 0x162   :  { %v125_v55 = vpop.permute.xlu1 %124 }
 0x163   :  { %v127_v56 = vmul.f32 %v125_v55, %v117_v48 }
 0x165   :  { %v137_v57 = vrot.slane %v127_v56, %v136_v54 }
 0x166   :  { %v132_v58 = vpop.permute.xlu1 %131 }
 0x167   :  { %v138_v59 = vmul.f32 %v137_v57, %v132_v58 }
 0x169   :  { %v139_v60 = vsub.f32 %v117_v48, %v138_v59 }
 0x16b   :  { %v142_v61 = vsel %vm128_vm10, %v137_v57, %v139_v60 }
 0x16c   :  { %156 = vperm.xlu1 %281, %v142_v61   ;;  %290 = vrcp.f32 %v142_v61 }
 0x170   :  { %282 = vset.pattern.permute.xlu1 %v350_v5 }
 0x176   :  { %v291_v62 = vpop.eup %290 }
 0x177   :  { %v144_v63 = vmul.f32 %v291_v62, %v142_v61 }
 0x179   :  { %v145_v0 = vsub.f32 2.0, %v144_v63 }
 0x17b   :  { %v146_v1 = vmul.f32 %v291_v62, %v145_v0 }
 0x17d   :  { %149 = vperm.xlu0 %280, %v146_v1  }
 0x181   :  { %283 = vset.pattern.permute.xlu0 %v350_v5 }
 0x1eb   :  { %v157_v10 = vpop.permute.xlu1 %156 }
 0x1fc   :  { %v150_v7 = vpop.permute.xlu0 %149 }
 0x1fd   :  { %v152_v8 = vmul.f32 %v150_v7, %v142_v61 }
 0x1ff   :  { %v162_v9 = vrot.slane %v152_v8, %v161_v6 }
 0x201   :  { %v163_v11 = vmul.f32 %v162_v9, %v157_v10 }
 0x203   :  { %v164_v12 = vsub.f32 %v142_v61, %v163_v11 }
 0x205   :  { %v167_v13 = vsel %vm153_vm11, %v162_v9, %v164_v12 }
 0x206   :  { %181 = vperm.xlu0 %283, %v167_v13   ;;  %292 = vrcp.f32 %v167_v13 }
 0x20a   :  { %285 = vset.pattern.permute.xlu0 %v351_v18 }
 0x210   :  { %v293_v14 = vpop.eup %292 }
 0x211   :  { %v169_v15 = vmul.f32 %v293_v14, %v167_v13 }
 0x213   :  { %v170_v16 = vsub.f32 2.0, %v169_v15 }
 0x215   :  { %v171_v17 = vmul.f32 %v293_v14, %v170_v16 }
 0x217   :  { %174 = vperm.xlu1 %282, %v171_v17  }
 0x21b   :  { %284 = vset.pattern.permute.xlu1 %v351_v18 }
 0x285   :  { %v182_v23 = vpop.permute.xlu0 %181 }
 0x296   :  { %v175_v20 = vpop.permute.xlu1 %174 }
 0x297   :  { %v177_v21 = vmul.f32 %v175_v20, %v167_v13 }
 0x299   :  { %v187_v22 = vrot.slane %v177_v21, %v186_v19 }
 0x29b   :  { %v188_v24 = vmul.f32 %v187_v22, %v182_v23 }
 0x29d   :  { %v189_v25 = vsub.f32 %v167_v13, %v188_v24 }
 0x29f   :  { %v192_v26 = vsel %vm178_vm12, %v187_v22, %v189_v25 }
 0x2a0   :  { %294 = vrcp.f32 %v192_v26 }
 0x2aa   :  { %v295_v27 = vpop.eup %294 }
 0x2ab   :  { %v194_v28 = vmul.f32 %v295_v27, %v192_v26 }
 0x2ad   :  { %v195_v29 = vsub.f32 2.0, %v194_v28 }
 0x2af   :  { %v196_v30 = vmul.f32 %v295_v27, %v195_v29 }
 0x2b1   :  { %199 = vperm.xlu1 %284, %v196_v30  }
 0x2b5   :  { %205 = vperm.xlu1 %284, %v192_v26  }
 0x330   :  { %v200_v32 = vpop.permute.xlu1 %199 }
 0x331   :  { %v202_v34 = vmul.f32 %v200_v32, %v192_v26 }
 0x333   :  { %v211_v35 = vrot.slane %v202_v34, %v210_v31 }
 0x334   :  { %v206_v36 = vpop.permute.xlu1 %205 }
 0x335   :  { %v212_v37 = vmul.f32 %v211_v35, %v206_v36 }
 0x337   :  { %v213_v38 = vsub.f32 %v192_v26, %v212_v37 }
 0x339   :  { %v216_v40 = vsel %vm84_vm7, %v211_v35, %v213_v38 }
 0x33a   :  { %v222_v41 = vsub.f32 %v216_v40, %v266_v39 }
 0x33c   :  { %v223_v42 = vsel %vm221_vm14, %v222_v41, 0.0 }
 0x33d   :  { %v224_v43 = vmul.f32 %v223_v42, %v223_v42 }
 0x33f   :  { %v226_v44 = vsel %vm225_vm15, %v224_v43, 0.0 }
 0x340   :  { %227 = vadd.xlane.f32.xlu0 %v226_v44 }
 0x3cd   :  { %v228_v45 = vpop.xlane.xlu0 %227 }
 0x3ce   :  { %v229_v46 = vrot.slane %v228_v45, 4 }
 0x3d0   :  { %v230_v47 = vadd.f32 %v229_v46, %v228_v45 }
 0x3d2   :  { %v231_v48 = vrot.slane %v230_v47, 2 }
 0x3d4   :  { %v232_v49 = vadd.f32 %v231_v48, %v230_v47 }
 0x3d6   :  { %v233_v50 = vrot.slane %v232_v49, 1 }
 0x3d8   :  { %v234_v51 = vadd.f32 %v233_v50, %v232_v49 }
 0x3da   :  { %267 = vpush %v234_v51 }
 0x40b   :  { %s268_s8 = spop %267 }
 0x40c   :  { %237 = sst [smem:[#allocation7]] %s268_s8 }
 0x40d   :  { %337 = shalt.err (!%p334_p13)
}
 0x40e   :  { %s352_s16 = smov [#allocation7]  }
 0x40f   :  { %245 = dma.smem_to_hbm %s352_s16, 16, %s450_s2, [#allocation5]  }
 0x410   :  { %342 = dma.done.wait [#allocation5], 16  }
 0x411   :  { %343 = vsyncadd [#allocation5], 4294967280 }
 0x412   :  { %249 = sfence }
 0x413   :  { %250 = vsyncpa [#allocation3], 1 }
 0x414   :  { %251 = vsyncpa [#allocation4], 1 }
 0x415   :  { %252 = vsyncpa [#allocation5], 1 }

</bundles_post_ra>
